<compile_context>
chip_gen: v7x
topology: tpu7x:2x2x1
jax: 0.10.0
libtpu: 0.0.40
codegen_flags: <defaults>
</compile_context>

<pallas_src>
import functools

import jax
import jax.numpy as jnp
from jax.experimental import pallas as pl
from jax.experimental.pallas import tpu as pltpu


def _find_closest_divisor(total: int, target: int) -> int:
    best = 1
    for d in range(1, total + 1):
        if total % d == 0 and abs(d - target) < abs(best - target):
            best = d
    return best


def _round_up(n: int, m: int) -> int:
    return ((n + m - 1) // m) * m


def _vmem_tile_bytes(rows: int, cols: int, itemsize: int) -> int:
    # VMEM tiles pad the trailing two dims to (8, 128).
    return _round_up(rows, 8) * _round_up(cols, 128) * itemsize


def _pick_tile_l(L_new: int, C_new: int, itemsize: int, budget_bytes: int = 2 << 20) -> int:
    """Largest L-tile that (a) satisfies the (8,128) block rule (multiple of 8 or the
    full dim) and (b) keeps one x block under `budget_bytes` (so the double-buffered
    pipeline stays well inside every generation's scoped VMEM, incl. v7x's 64 MiB)."""
    divisors = [d for d in range(1, L_new + 1) if L_new % d == 0]
    aligned = [d for d in divisors if d % 8 == 0]
    candidates = aligned if aligned else [L_new]        # full-dim block is always legal
    fitting = [d for d in candidates if _vmem_tile_bytes(d, C_new, itemsize) <= budget_bytes]
    return max(fitting) if fitting else min(candidates)


def _initial_latent_kernel(xs_ref, keep_ref, w_ref, b_ref, z_ref):
    """One (batch, L-tile) block.
      xs_ref  : (1, tile_L, C_new)  mask-multiplied, head-stacked chunks (compute dtype)
      keep_ref: (1, tile_L, 1)      f32 0/1 row multiplier (= ~latent_pad)
      w_ref   : (C_new, d_new)      to_latent weight, pre-transposed (compute dtype)
      b_ref   : (1, d_new)          f32 bias
      z_ref   : (1, tile_L, d_new)
    """
    # z = to_latent(z_chunks)  -> MXU matmul, f32 accumulation
    z = jnp.dot(xs_ref[0], w_ref[...], preferred_element_type=jnp.float32)
    # bias-add + masked_fill(latent_pad, 0)  (keep is 0/1), both in f32
    z = (z + b_ref[...]) * keep_ref[0]
    z_ref[0] = z.astype(z_ref.dtype)


@functools.partial(
    jax.jit, static_argnames=("nh_stack", "L_new", "C_new", "d_new", "compute_dtype")
)
def initial_latent_transform(x, mask, w_t, b, *, nh_stack, L_new, C_new, d_new,
                             compute_dtype=None):
    B, S, H = x.shape
    dk = H // nh_stack
    out_dtype = x.dtype
    cdtype = jnp.dtype(compute_dtype) if compute_dtype is not None else jnp.dtype(x.dtype)

    # ---- layout glue (single fused pass over x; everything else is tiny) ----
    # torch: x = x * mask.unsqueeze(-1)   -- folded into the restack copy below
    xm = x * mask[:, :, None].astype(x.dtype)
    # torch: cat(split(x, dk, -1), dim=1).view(B, -1).view(B, L_new, C_new)
    xs = (xm.reshape(B, S, nh_stack, dk)
            .transpose(0, 2, 1, 3)
            .reshape(B, L_new, C_new)
            .astype(cdtype))

    # latent_pad depends only on mask[B, S]:
    # chunk l of the NON-stacked flat mask covers flat positions [l*C_new, (l+1)*C_new);
    # token s covers [s*H, (s+1)*H).  pad <=> no valid (mask != 0) token overlaps the
    # chunk, which equals torch's `mask_chunks.sum(-1) == 0` for 0/1 masks (and avoids
    # the fragile float-equality on a soft mask).
    l_start = jnp.arange(L_new, dtype=jnp.int32) * C_new
    s_start = jnp.arange(S, dtype=jnp.int32) * H
    covered = ((l_start[:, None] < s_start[None, :] + H)
               & (s_start[None, :] < l_start[:, None] + C_new))              # [L_new, S]
    any_valid = jnp.any(covered[None, :, :] & (mask != 0)[:, None, :], axis=-1)  # [B, L_new]
    latent_pad = ~any_valid
    keep = any_valid.astype(jnp.float32)[:, :, None]                         # [B, L_new, 1]

    w_c = w_t.astype(cdtype)                    # (C_new, d_new)
    b2 = b.reshape(1, d_new).astype(jnp.float32)

    tile_l = _pick_tile_l(L_new, C_new, cdtype.itemsize)
    n_l = L_new // tile_l

    # Conservative VMEM estimate (double-buffer every operand block); keep the scoped
    # limit modest so it is valid on v5e (16 MiB default) through v7x (64 MiB physical).
    vmem_needed = 2 * (
        _vmem_tile_bytes(tile_l, C_new, cdtype.itemsize)   # xs block
        + _vmem_tile_bytes(tile_l, 1, 4)                   # keep block
        + _vmem_tile_bytes(C_new, d_new, cdtype.itemsize)  # weight
        + _vmem_tile_bytes(1, d_new, 4)                    # bias
        + _vmem_tile_bytes(tile_l, d_new, 4)               # z block
    )
    vmem_limit = int(min(max(2 * vmem_needed, 32 << 20), 48 << 20))

    z = pl.pallas_call(
        _initial_latent_kernel,
        out_shape=jax.ShapeDtypeStruct((B, L_new, d_new), out_dtype),
        grid_spec=pltpu.PrefetchScalarGridSpec(
            num_scalar_prefetch=0,
            grid=(B, n_l),
            in_specs=[
                pl.BlockSpec((1, tile_l, C_new), lambda bi, li: (bi, li, 0)),
                pl.BlockSpec((1, tile_l, 1), lambda bi, li: (bi, li, 0)),
                pl.BlockSpec((C_new, d_new), lambda bi, li: (0, 0)),
                pl.BlockSpec((1, d_new), lambda bi, li: (0, 0)),
            ],
            out_specs=pl.BlockSpec((1, tile_l, d_new), lambda bi, li: (bi, li, 0)),
        ),
        compiler_params=pltpu.CompilerParams(
            dimension_semantics=("parallel", "parallel"),
            vmem_limit_bytes=vmem_limit,
        ),
    )(xs, keep, w_c, b2)

    return z, latent_pad


def ref_forward(x, mask, w, b, *, nh_stack, L_new, C_new):
    """Pure-JAX replica of the PyTorch forward (w is torch-style [d_new, C_new])."""
    B, S, H = x.shape
    xm = x * mask[..., None]
    xs = jnp.concatenate(jnp.split(xm, nh_stack, axis=-1), axis=1)   # [B, nh*S, dk]
    zc = xs.reshape(B, L_new, C_new)
    z = zc @ w.T + b
    mef = jnp.broadcast_to(mask[..., None], (B, S, H)).reshape(B, -1)
    mc = mef.reshape(B, L_new, C_new)
    pad = mc.sum(-1) == 0
    z = jnp.where(pad[..., None], 0.0, z)
    return z, pad


if __name__ == "__main__":
    # small config consistent with the module
    B, S, H = 2, 8, 32
    nh_stack = 4
    d_new = 32
    dk = H // nh_stack
    total = S * H
    target_L = max(2, S // 2)                    # cfg.target_l_new = None path
    L_new = _find_closest_divisor(total, target_L)
    C_new = total // L_new

    key = jax.random.PRNGKey(0)
    kx, kw, kb = jax.random.split(key, 3)
    x = jax.random.normal(kx, (B, S, H), dtype=jnp.float32)
    # batch 0 fully valid, batch 1 has 5 valid tokens (exercises latent_pad)
    lengths = jnp.array([[S], [5]])
    mask = (jnp.arange(S)[None, :] < lengths).astype(jnp.float32)    # [B, S]

    # deterministic parameter init (torch Linear: weight [d_new, C_new], bias [d_new])
    w = jax.random.normal(kw, (d_new, C_new), dtype=jnp.float32) / jnp.sqrt(C_new)
    b = jax.random.normal(kb, (d_new,), dtype=jnp.float32) * 0.01

    z_ref, pad_ref = ref_forward(x, mask, w, b, nh_stack=nh_stack, L_new=L_new, C_new=C_new)

    # f32 path: exact semantics of the module
    z, latent_pad = initial_latent_transform(
        x, mask, w.T, b, nh_stack=nh_stack, L_new=L_new, C_new=C_new, d_new=d_new
    )
    z = jax.block_until_ready(z)
    latent_pad = jax.block_until_ready(latent_pad)
    assert z.shape == (B, L_new, d_new) and latent_pad.shape == (B, L_new)
    assert jnp.allclose(z, z_ref, atol=1e-5, rtol=1e-5)
    assert bool(jnp.all(latent_pad == pad_ref))

    # bf16 compute path (halved HBM traffic, f32 accumulation/epilogue): loose tolerance
    z_bf, pad_bf = initial_latent_transform(
        x, mask, w.T, b, nh_stack=nh_stack, L_new=L_new, C_new=C_new, d_new=d_new,
        compute_dtype=jnp.bfloat16
    )
    z_bf = jax.block_until_ready(z_bf)
    assert jnp.allclose(z_bf, z_ref, atol=5e-2, rtol=5e-2)
    assert bool(jnp.all(pad_bf == pad_ref))

    # TODO(synk): inverse_transform (from_latent / gate path) not implemented; only forward().
    print("KERNEL_OK")
</pallas_src>

<mosaic_0001>
module attributes {stable_mosaic.version = 11 : i64} {
  func.func @_initial_latent_kernel(%arg0: i32, %arg1: i32, %arg2: memref<1x4x64xf32, #tpu.memory_space<vmem>>, %arg3: memref<1x4x1xf32, #tpu.memory_space<vmem>>, %arg4: memref<64x32xf32, #tpu.memory_space<vmem>>, %arg5: memref<1x32xf32, #tpu.memory_space<vmem>>, %arg6: memref<1x4x32xf32, #tpu.memory_space<vmem>>) attributes {dimension_semantics = [#tpu.dimension_semantics<parallel>, #tpu.dimension_semantics<parallel>], iteration_bounds = array<i64: 2, 1>, scalar_prefetch = 0 : i64, scratch_operands = 0 : i64, tpu.core_type = #tpu.core_type<tc>, window_params = [{transform_indices = @transform_0, window_bounds = array<i64: 1, 4, 64>}, {transform_indices = @transform_1, window_bounds = array<i64: 1, 4, 1>}, {pipeline_mode = #tpu.pipeline_mode<synchronous>, transform_indices = @transform_2, window_bounds = array<i64: 64, 32>}, {pipeline_mode = #tpu.pipeline_mode<synchronous>, transform_indices = @transform_3, window_bounds = array<i64: 1, 32>}, {transform_indices = @transform_4, window_bounds = array<i64: 1, 4, 32>}]} {
    %c0 = arith.constant 0 : index
    %c0_0 = arith.constant 0 : index
    %c0_1 = arith.constant 0 : index
    %0 = vector.load %arg2[%c0, %c0_0, %c0_1] : memref<1x4x64xf32, #tpu.memory_space<vmem>>, vector<1x4x64xf32>
    %1 = vector.shape_cast %0 : vector<1x4x64xf32> to vector<4x64xf32>
    %c0_2 = arith.constant 0 : index
    %c0_3 = arith.constant 0 : index
    %2 = vector.load %arg4[%c0_2, %c0_3] : memref<64x32xf32, #tpu.memory_space<vmem>>, vector<64x32xf32>
    %cst = arith.constant dense<0.000000e+00> : vector<4x32xf32>
    %3 = tpu.matmul %1, %2, %cst {dimension_numbers = #tpu.dot_dimension_numbers<[1], [0], [0], [1], [0, 0, 1, 1], [], []>} : vector<4x64xf32>, vector<64x32xf32>, vector<4x32xf32> -> vector<4x32xf32>
    %c0_4 = arith.constant 0 : index
    %c0_5 = arith.constant 0 : index
    %4 = vector.load %arg5[%c0_4, %c0_5] : memref<1x32xf32, #tpu.memory_space<vmem>>, vector<1x32xf32>
    %5 = vector.broadcast %4 : vector<1x32xf32> to vector<4x32xf32>
    %6 = arith.addf %3, %5 : vector<4x32xf32>
    %c0_6 = arith.constant 0 : index
    %c0_7 = arith.constant 0 : index
    %c0_8 = arith.constant 0 : index
    %7 = vector.load %arg3[%c0_6, %c0_7, %c0_8] : memref<1x4x1xf32, #tpu.memory_space<vmem>>, vector<1x4x1xf32>
    %8 = vector.shape_cast %7 : vector<1x4x1xf32> to vector<4x1xf32>
    %9 = vector.broadcast %8 : vector<4x1xf32> to vector<4x32xf32>
    %10 = arith.mulf %6, %9 : vector<4x32xf32>
    %c0_9 = arith.constant 0 : index
    %c0_10 = arith.constant 0 : index
    %c0_11 = arith.constant 0 : index
    %11 = vector.load %arg6[%c0_9, %c0_10, %c0_11] : memref<1x4x32xf32, #tpu.memory_space<vmem>>, vector<1x4x32xf32>
    %12 = vector.shape_cast %11 : vector<1x4x32xf32> to vector<4x32xf32>
    %13 = vector.shape_cast %10 : vector<4x32xf32> to vector<1x4x32xf32>
    tpu.vector_store %arg6[%c0_9, %c0_10, %c0_11], %13 {strides = array<i32>} : memref<1x4x32xf32, #tpu.memory_space<vmem>>, vector<1x4x32xf32>,
    return
  }
  func.func @transform_0(%arg0: i32, %arg1: i32) -> (i32, i32, i32) {
    %c0_i32 = arith.constant 0 : i32
    %c0_i32_0 = arith.constant 0 : i32
    return %arg0, %arg1, %c0_i32 : i32, i32, i32
  }
  func.func @transform_1(%arg0: i32, %arg1: i32) -> (i32, i32, i32) {
    %c0_i32 = arith.constant 0 : i32
    %c0_i32_0 = arith.constant 0 : i32
    return %arg0, %arg1, %c0_i32 : i32, i32, i32
  }
  func.func @transform_2(%arg0: i32, %arg1: i32) -> (i32, i32) {
    %c0_i32 = arith.constant 0 : i32
    %c0_i32_0 = arith.constant 0 : i32
    %c0_i32_1 = arith.constant 0 : i32
    return %c0_i32, %c0_i32_0 : i32, i32
  }
  func.func @transform_3(%arg0: i32, %arg1: i32) -> (i32, i32) {
    %c0_i32 = arith.constant 0 : i32
    %c0_i32_0 = arith.constant 0 : i32
    %c0_i32_1 = arith.constant 0 : i32
    return %c0_i32, %c0_i32_0 : i32, i32
  }
  func.func @transform_4(%arg0: i32, %arg1: i32) -> (i32, i32, i32) {
    %c0_i32 = arith.constant 0 : i32
    %c0_i32_0 = arith.constant 0 : i32
    return %arg0, %arg1, %c0_i32 : i32, i32, i32
  }
}

</mosaic_0001>

<bundles_post_ra>
// kernel: initial_latent_transform.1
= control target key start
LH: loop header
LB: loop body
LE: loop exit
PB: predicated region body
PF: predicated region fallthrough
CT: control target
= control target key end

     0   :  { %9 = vsyncpa [#allocation3], 0  ;;  %s812_s0 = inlined_call_operand.vmem [shape: f32[2,4,64], index: 0, kind: input, shape index: {}]   ;;  %s813_s1 = inlined_call_operand.vmem [shape: f32[2,4,1], index: 1, kind: input, shape index: {}]   ;;  %s814_s2 = inlined_call_operand.vmem [shape: f32[64,32], index: 2, kind: input, shape index: {}]   ;;  %s815_s3 = inlined_call_operand.vmem [shape: f32[1,32], index: 3, kind: input, shape index: {}]   ;;  %s816_s4 = inlined_call_operand.hbm [shape: f32[2,4,32], index: 4, kind: output, shape index: {}]  }
   0x1   :  { %11 = vsyncpa [#allocation3 + $0x1], 0  ;;  %s670_s15 = smov 0   ;;  %s672_s16 = smov 0  }
   0x2   :  { %s674_s17 = smov 0   ;;  %s676_s18 = smov 0  }
   0x3   :  { %s678_s19 = smov 0   ;;  %s680_s20 = smov 0  }
   0x4 LB: > { %s446_s21 = sadd.s32 4294967295, %s638_s20   ;;  %s447_s22 = sadd.s32 4294967294, %s638_s20   ;;  %s638_s20 = sphi %s680_s20, %s17_s20   ;;  %s634_s19 = sphi %s678_s19, %s823_s19   ;;  %s630_s18 = sphi %s676_s18, %s822_s18   ;;  %s626_s17 = sphi %s674_s17, %s821_s17   ;;  %s622_s16 = sphi %s672_s16, %s820_s16   ;;  %s618_s15 = sphi %s670_s15, %s819_s15  }
   0x5   : > { %s29_s23 = sadd.s32 1, %s634_s19  ;;  %s136_s24 = sadd.s32 1, %s626_s17 }
   0x6   : > { %p31_p0 = scmp.ge.s32.totalorder %s29_s23, 2  ;;  %p146_p1 = scmp.ne.s32.totalorder %s626_s17, %s622_s16 }
   0x7   : > { %p147_p2 = scmp.eq.s32.totalorder %s446_s21, 1  ;;  %p152_p3 = scmp.ne.s32.totalorder %s622_s16, %s618_s15 }
   0x8   : > { %s825_s23 = smov (%p31_p0, %s29_s23), 0  ;;  %p153_p5 = scmp.eq.s32.totalorder %s447_s22, 1 }
   0x9   : > { %p710_p4 = por %p147_p2, %p146_p1  ;;  %s131_s26 = ssub.s32 %s634_s19, %s825_s23 }
   0xa   : > { %p450_p6 = scmp.ge.s32.totalorder %s638_s20, 1  ;;  %p134_p7 = scmp.eq.s32.totalorder %s131_s26, 0 }
   0xb   : > { %p717_p8 = por %p153_p5, %p152_p3  ;;  %p197_p9 = scmp.lt.s32.totalorder %s638_s20, 3 }
   0xc   : > { %s723_s28 = scalar_select %p134_p7, %s626_s17, %s136_s24  }
   0xd   : > { %p198_p10 = pnand %p450_p6, %p197_p9 }
   0xe   : > { %v247_v0 = vld [vmem:[%s814_s2] sm:$0xff] (!%p198_p10)  ;;  %v248_v1 = vld [vmem:[%s814_s2 + $0x8] sm:$0xff] (!%p198_p10)  ;;  %v249_v2 = vld [vmem:[%s814_s2 + $0x10] sm:$0xff] (!%p198_p10)  ;;  %v640_v3 = vmov (!%p198_p10), 0.0|0.0   ;;  %vm641_vm0 = vmmov (!%p198_p10), 0   ;;  %v642_v6 = vmov (!%p198_p10), 0.0  }
   0xf   : > { %201 = sbr.rel (%p198_p10) target bundleno = 262 (0x106), region = 36  ;;  %488 = vmatprep.subr.bf16.mxu0 (!%p198_p10), %v640_v3  ;;  %v489_v4 = vpack.c.bf16 (!%p198_p10), %v248_v1, %v247_v0  ;;  %v250_v5 = vld [vmem:[%s814_s2 + $0x18] sm:$0xff] (!%p198_p10)  ;;  %485 = vmatprep.mubr.msk.f32.mxu0 (!%p198_p10), %vm641_vm0, %v642_v6  ;;  %p232_p11 = scmp.lt.s32.totalorder (!%p198_p10), %s630_s18, 1  ;;  %v643_v7 = vmov (!%p198_p10), 0   ;;  %v251_v9 = vld [vmem:[%s814_s2 + $0x20] sm:$0xff] (!%p198_p10)  ;;  %v252_v10 = vld [vmem:[%s814_s2 + $0x28] sm:$0xff] (!%p198_p10) }
  0x10   : > { %559 = vset.pattern.permute.xlu0 (!%p198_p10), %v643_v7  ;;  %v492_v8 = vpack.c.bf16 (!%p198_p10), %v250_v5, %v249_v2  ;;  %v495_v11 = vpack.c.bf16 (!%p198_p10), %v252_v10, %v251_v9  ;;  %v253_v13 = vld [vmem:[%s814_s2 + $0x30] sm:$0xff] (!%p198_p10)  ;;  %v254_v14 = vld [vmem:[%s814_s2 + $0x38] sm:$0xff] (!%p198_p10)  ;;  %vm262_vm1 = vcmask (!%p198_p10), 523264   ;;  %v454_v17 = vld [vmem:[%s815_s3] ss:$0 sm:$0xff] (!%p198_p10)  ;;  %s457_s21 = sshll.u32 (!%p198_p10), %s630_s18, 6 }
  0x11   : > { %490 = vmatpush3.bf16.msra.mxu0 (!%p198_p10), %v489_v4  ;;  %v498_v15 = vpack.c.bf16 (!%p198_p10), %v254_v14, %v253_v13  ;;  %vm343_vm2 = vcmask (!%p198_p10), 257024   ;;  %s765_s30 = scalar_lea.hbm (!%p198_p10), %s816_s4, %s457_s21 }
  0x12   : > { %491 = vmatprep.subr.bf16.mxu0 (!%p198_p10), %v640_v3 }
  0x15   : > { %493 = vmatpush3.bf16.msra.mxu0 (!%p198_p10), %v492_v8 }
  0x16   : > { %s233_s11 = scalar_select %p232_p11, %s630_s18, 1  ;;  %494 = vmatprep.subr.bf16.mxu0 %v640_v3 }
  0x17   : > { %s644_s18 = smov [#allocation2]  }
  0x18   : > { %s452_s22 = sshll.u32 %s233_s11, 2  ;;  %s229_s11 = sand.u32 1, %s622_s16  }
  0x19   : > { %s245_s29 = scalar_lea.vmem %s813_s1, %s452_s22  ;;  %496 = vmatpush3.bf16.msra.mxu0 %v495_v11  ;;  %s238_s10 = scalar_lea.vmem %s812_s0, %s452_s22 }
  0x1a   : > { %v336_v12 = vld [vmem:[%s245_s29] sm:$0xf]  ;;  %497 = vmatprep.subr.bf16.mxu0 %v640_v3  ;;  %s451_s12 = sshll.u32 %s229_s11, 2  ;;  %s346_s5 = scalar_lea.sflag [#allocation3], %s229_s11 }
  0x1b   : > { %339 = vperm.xlu0 %559, %v336_v12   ;;  %v246_v16 = vld [vmem:[%s238_s10] sm:$0xf]  ;;  %s231_s24 = scalar_lea.vmem [#allocation2], %s451_s12  ;;  %s564_s7 = sshll.u32 %s644_s18, 4  ;;  %s565_s7 = int_to_ptr.vmem [resolvable:$false] %s564_s7 }
  0x1c   : > { %s360_s26 = sshll.u32 %s231_s24, 4  ;;  %s566_s8 = scalar_lea.vmem %s565_s7, 128  ;;  %s767_s26 = int_to_ptr.vmem [resolvable:$true] %s360_s26 }
  0x1d   : > { %499 = vmatpush3.bf16.msra.mxu0 %v498_v15  ;;  %s560_s6 = scalar_lea.vmem %s767_s26, 64  ;;  %p567_p1 = scmp.lt.s32.totalorder %s767_s26, %s565_s7 }
  0x1e   : > { %p561_p12 = scmp.ne.s32.totalorder %s767_s26, %s560_s6  ;;  %p568_p2 = scmp.lt.s32.totalorder %s566_s8, %s560_s6 }
  0x20   : > { %486 = vmatmul.mubr.msk.f32.vlgmr.msra.gmra.mrb[0].mxu0 %vm262_vm1, %v246_v16  ;;  %p562_p13 = pnand %p561_p12, %p710_p4  ;;  %p569_p3 = por %p568_p2, %p567_p1 }
  0x22   : > { %p563_p0 = pneg %p562_p13 }
  0x24   : > { %p570_p5 = pnand %p569_p3, %p563_p0 }
  0x9a   : > { %v340_v19 = vpop.permute.xlu0 %339 }
  0xf3   : > { %v332_v18 = vpop.f32.mrb[0].mxu0 }
  0xf4   : > { %v333_v20 = vadd.f32 %v454_v17, %v332_v18  ;;  %v487_v21 = vpop.f32.mrb[1].mxu0 }
  0xf6   : > { %v342_v22 = vmul.f32 %v340_v19, %v333_v20 }
  0xf8   : > { %344 = vst.msk [vmem:[%s231_s24] sm:$0xf] %vm343_vm2, %v342_v22 }
  0xf9   : > { %573 = shalt.err (!%p570_p5)
}
  0xfa   : > { %s574_s9 = scalar_lea.hbm %s765_s30, 64  ;;  %s578_s12 = scalar_lea.hbm %s816_s4, 128 }
  0xfb   : > { %p575_p6 = scmp.ne.s32.totalorder %s765_s30, %s574_s9  ;;  %p579_p10 = scmp.lt.u32.totalorder %s765_s30, %s816_s4 }
  0xfc   : > { %p580_p11 = scmp.lt.u32.totalorder %s578_s12, %s574_s9  ;;  %p582_p13 = scmp.lt.u32.totalorder %s574_s9, %s765_s30 }
  0xfd   : > { %p576_p7 = pnand %p575_p6, %p710_p4 }
  0xfe   : > { %p581_p12 = por %p580_p11, %p579_p10 }
  0xff   : > { %p577_p9 = pneg %p576_p7 }
 0x100   : > { %p583_p0 = por %p582_p13, %p581_p12 }
 0x102   : > { %p584_p1 = pnand %p583_p0, %p577_p9 }
 0x104   : > { %587 = shalt.err (!%p584_p1)
}
 0x105   : > { %500 = dma.vmem_to_hbm [thread:$0]  (%p710_p4), %s767_s26, 64, %s765_s30, %s346_s5  }
 0x106 PF: > { %p506_p2 = scmp.ge.s32.totalorder %s638_s20, 2  ;;  %s372_s21 = sand.u32 1, %s618_s15  }
 0x107   : > { %s373_s24 = scalar_lea.sflag [#allocation3], %s372_s21 }
 0x108   : > { %p503_p3 = pnand %p506_p2, %p717_p8 }
 0x10a   : > { %613 = dma.done.wait (!%p503_p3), %s373_s24, 64  }
 0x10b   : > { %615 = vsyncadd (!%p503_p3), %s373_s24, 4294967232  ;;  %s17_s20 = sadd.s32 1, %s638_s20   ;;  %s819_s15 = smov %s622_s16 }
 0x10c   : > { %p14_p5 = scmp.ge.s32.totalorder %s17_s20, 4   ;;  %s820_s16 = smov %s626_s17 }
 0x10d   : > { %s821_s17 = smov %s723_s28  ;;  %s822_s18 = smov %s634_s19 }
 0x10e   : > { %s823_s19 = smov %s825_s23  ;;  %16 = sbr.rel (!%p14_p5) target bundleno = 4 (0x4), region = 74 }
 0x115   :  { %378 = vsyncpa [#allocation3], 1 }
 0x116   :  { %380 = vsyncpa [#allocation3 + $0x1], 1 }

</bundles_post_ra>
